<compile_context>
chip_gen: v7x
topology: tpu7x:2x2x1
jax: 0.10.0
libtpu: 0.0.40
codegen_flags: <defaults>
</compile_context>

<pallas_src>
import functools
import math

import jax
import jax.numpy as jnp
from jax import lax
from jax.experimental import pallas as pl
from jax.experimental.pallas import tpu as pltpu


_ACTIVATIONS = {
    "Sigmoid": jax.nn.sigmoid,
    "ReLU": jax.nn.relu,
    "Softplus": jax.nn.softplus,
    "Tanh": jnp.tanh,
    "Identity": lambda x: x,
}

# log(1e-4), as produced by torch.log(clamp(one_hot, min=1e-4)) on off-label entries.
_NEG_LOG_1E4 = -math.log(1e-4)  # ~ 9.210340371976184


def _mixed_loss_kernel(pred_ref, lab_ref, w_ref, out_ref, *, act_fn, batch_size):
    p_idx = pl.program_id(0)            # parallel partition (megacore)
    t_idx = pl.program_id(1)            # sequential batch tile within this partition
    T = pl.num_programs(1)
    tb, c = pred_ref.shape

    @pl.when(t_idx == 0)
    def _init():
        out_ref[...] = jnp.zeros_like(out_ref)

    x = pred_ref[...].astype(jnp.float32)            # (TB, C) logits (f32)
    labels = lab_ref[...]                            # (TB, 1) int32

    # one-hot labels via lane iota (no gather needed)
    col = lax.broadcasted_iota(jnp.int32, (tb, c), 1)
    onehot = (col == labels).astype(jnp.float32)     # (TB, C)

    # softmax / log-softmax pieces (reduce over class axis = lanes)
    m = jnp.max(x, axis=1, keepdims=True)            # (TB, 1)
    e = jnp.exp(x - m)                               # (TB, C)
    s = jnp.sum(e, axis=1, keepdims=True)            # (TB, 1)
    inv_s = pl.reciprocal(s)                         # exact reciprocal (EUP), not approx
    lse = jnp.log(s) + m                             # (TB, 1)

    x_lab = jnp.sum(x * onehot, axis=1, keepdims=True)
    ce = lse - x_lab                                 # per-sample cross entropy

    p = e * inv_s                                    # softmax (TB, C)
    p_lab = jnp.sum(e * onehot, axis=1, keepdims=True) * inv_s   # softmax at the label
    sum_p = s * inv_s                                # explicit sum(p) (~1, keep explicit)

    # mae = |1 - p_lab| + sum_{j != lab} p_j  ;  p_lab <= 1 so no abs needed
    mae = (1.0 - p_lab) + (sum_p - p_lab)
    # mse = sum(p^2) - 2*p_lab + 1
    mse = jnp.sum(p * p, axis=1, keepdims=True) - 2.0 * p_lab + 1.0
    # rce = -sum(clip(p) * log(clip(onehot))) = (-log 1e-4) * (sum(clip(p)) - clip(p_lab))
    p_cl = jnp.clip(p, 1e-7, 1.0)
    rce = _NEG_LOG_1E4 * (jnp.sum(p_cl, axis=1, keepdims=True)
                          - jnp.clip(p_lab, 1e-7, 1.0))

    w = act_fn(w_ref[...].astype(jnp.float32))       # (TB, 4) per-sample weights
    loss = (w[:, 0:1] * ce + w[:, 3:4] * rce
            + w[:, 1:2] * mae + w[:, 2:3] * mse)     # (TB, 1)

    # mask rows beyond the real batch (last tile may be partial; select kills NaN/Inf)
    row0 = (p_idx * T + t_idx) * tb
    rows = row0 + lax.broadcasted_iota(jnp.int32, (tb, 1), 0)
    loss = jnp.where(rows < batch_size, loss, 0.0)

    # collapse to a per-partition scalar accumulator (output-resident across t)
    out_ref[...] += jnp.sum(loss, axis=0, keepdims=True)[None, :, :]


def _round_up(x, m):
    return ((x + m - 1) // m) * m


def _choose_tiling(b, c, in_itemsize, tb=None):
    """Return (tb_eff, P, T) with cdiv(b, tb_eff) == P * T tiles, P in {1, 2}."""
    if tb is None:
        # ~24 MiB working set per step: double-buffered pred block + ~6 live f32 (TB,C)
        # temporaries + per-row scalars.  Leaves headroom under the 48 MiB VMEM limit
        # (and v7x's 64 MiB physical VMEM).
        per_row = (6 * 4 + 2 * in_itemsize) * c + 64
        tb = max(8, min(32768, (24 * 1024 * 1024) // per_row))
    tb = int(tb)

    if b <= 8:
        return b, 1, 1                               # single full-batch tile

    # At least two tiles so both v7x TensorCores get work (parallel axis P=2).
    tb_eff = min(tb, _round_up(pl.cdiv(b, 2), 8))
    tb_eff = max(8, (tb_eff // 8) * 8)
    tiles = pl.cdiv(b, tb_eff)
    if tiles % 2 != 0 and tiles > 1:
        # nudge the tile size so the tile count becomes even (one extra, smaller tile)
        alt = max(8, _round_up(pl.cdiv(b, tiles + 1), 8))
        if alt < b and pl.cdiv(b, alt) % 2 == 0:
            tb_eff = alt
            tiles = pl.cdiv(b, alt)
    if tiles % 2 == 0:
        return tb_eff, 2, tiles // 2
    return tb_eff, 1, tiles


def mixed_loss(pred, labels, loss_weight_per_sample, *, activation_type="Sigmoid", tb=None):
    """Pallas TPU implementation of Mixed_loss_sample.forward. Returns scalar f32."""
    assert pred.ndim == 2, "pred must be (batch, num_classes)"
    b, c = pred.shape
    assert labels.shape == (b,)
    assert loss_weight_per_sample.shape == (b, 4)
    act_fn = _ACTIVATIONS[activation_type]

    labels2d = labels.astype(jnp.int32).reshape(b, 1)
    tb_eff, P, T = _choose_tiling(b, c, jnp.dtype(pred.dtype).itemsize, tb=tb)

    kernel = functools.partial(_mixed_loss_kernel, act_fn=act_fn, batch_size=b)

    partials = pl.pallas_call(
        kernel,
        out_shape=jax.ShapeDtypeStruct((P, 1, 1), jnp.float32),
        grid_spec=pltpu.PrefetchScalarGridSpec(
            num_scalar_prefetch=0,
            grid=(P, T),
            in_specs=[
                pl.BlockSpec((tb_eff, c), lambda p, t: (p * T + t, 0)),
                pl.BlockSpec((tb_eff, 1), lambda p, t: (p * T + t, 0)),
                pl.BlockSpec((tb_eff, 4), lambda p, t: (p * T + t, 0)),
            ],
            out_specs=pl.BlockSpec((1, 1, 1), lambda p, t: (p, 0, 0)),
        ),
        compiler_params=pltpu.CompilerParams(
            dimension_semantics=("parallel", "arbitrary"),
            vmem_limit_bytes=48 * 1024 * 1024,
        ),
    )(pred, labels2d, loss_weight_per_sample)

    # mean over the batch (masked/padded rows contributed exactly 0)
    return jnp.sum(partials) / jnp.float32(b)


def _mixed_loss_ref(pred, labels, w, activation_type):
    """Pure-JAX reference with the same math as the PyTorch module."""
    act = _ACTIVATIONS[activation_type]
    c = pred.shape[1]
    predf = pred.astype(jnp.float32)
    logp = jax.nn.log_softmax(predf, axis=1)
    onehot = jax.nn.one_hot(labels, c, dtype=jnp.float32)
    ce = -jnp.sum(onehot * logp, axis=1)
    p = jax.nn.softmax(predf, axis=1)
    mae = jnp.sum(jnp.abs(p - onehot), axis=1)
    mse = jnp.sum((p - onehot) ** 2, axis=1)
    rce = -jnp.sum(jnp.clip(p, 1e-7, 1.0) * jnp.log(jnp.clip(onehot, 1e-4, 1.0)), axis=1)
    a = act(w.astype(jnp.float32))
    loss = a[:, 0] * ce + a[:, 3] * rce + a[:, 1] * mae + a[:, 2] * mse
    return jnp.mean(loss)


if __name__ == "__main__":
    key = jax.random.PRNGKey(0)
    ok = True

    # (b, c, tb_override, activation, dtype):
    #  * (2, 4)      single tile, P=1
    #  * (50, 10)    auto tiling  -> P=2, partial last tile masked
    #  * (50, 10, 8) forced tiles -> P=1, T=7 sequential accumulation
    #  * (64, 10, 16, bf16) -> P=2, T=2, bf16 input upcast
    cases = [
        (2, 4, None, "Sigmoid", jnp.float32),
        (50, 10, None, "Sigmoid", jnp.float32),
        (50, 10, 8, "Tanh", jnp.float32),
        (64, 10, 16, "Sigmoid", jnp.bfloat16),
    ]
    for (b, c, tb_override, act, dt) in cases:
        k1, k2, k3, key = jax.random.split(key, 4)
        pred = jax.random.normal(k1, (b, c), dtype=jnp.float32).astype(dt)
        labels = jax.random.randint(k2, (b,), 0, c, dtype=jnp.int32)
        lw = jax.random.normal(k3, (b, 4), dtype=jnp.float32)

        loss = mixed_loss(pred, labels, lw, activation_type=act, tb=tb_override)
        jax.block_until_ready(loss)

        ref = _mixed_loss_ref(pred, labels, lw, act)
        if not jnp.allclose(loss, ref, rtol=3e-5, atol=3e-5):
            ok = False
            print("MISMATCH", (b, c, tb_override, act, str(dt)), float(loss), float(ref))

    if ok:
        print("KERNEL_OK")
</pallas_src>

<mosaic_0001>
module attributes {stable_mosaic.version = 11 : i64} {
  func.func @_mixed_loss_kernel(%arg0: i32, %arg1: i32, %arg2: memref<2x4xf32, #tpu.memory_space<vmem>>, %arg3: memref<2x1xi32, #tpu.memory_space<vmem>>, %arg4: memref<2x4xf32, #tpu.memory_space<vmem>>, %arg5: memref<1x1x1xf32, #tpu.memory_space<vmem>>) attributes {dimension_semantics = [#tpu.dimension_semantics<parallel>, #tpu.dimension_semantics<arbitrary>], iteration_bounds = array<i64: 1, 1>, scalar_prefetch = 0 : i64, scratch_operands = 0 : i64, tpu.core_type = #tpu.core_type<tc>, window_params = [{transform_indices = @transform_0, window_bounds = array<i64: 2, 4>}, {transform_indices = @transform_1, window_bounds = array<i64: 2, 1>}, {transform_indices = @transform_2, window_bounds = array<i64: 2, 4>}, {transform_indices = @transform_3, window_bounds = array<i64: 1, 1, 1>}]} {
    %c0_i32 = arith.constant 0 : i32
    %0 = arith.cmpi eq, %arg1, %c0_i32 : i32
    %1 = arith.extui %0 : i1 to i32
    %c0_i32_0 = arith.constant 0 : i32
    %2 = arith.cmpi ne, %1, %c0_i32_0 : i32
    scf.if %2 {
      %cst_29 = arith.constant 0.000000e+00 : f32
      %89 = vector.broadcast %cst_29 : f32 to vector<1x1x1xf32>
      %c0_30 = arith.constant 0 : index
      %c0_31 = arith.constant 0 : index
      %c0_32 = arith.constant 0 : index
      %90 = vector.load %arg5[%c0_30, %c0_31, %c0_32] : memref<1x1x1xf32, #tpu.memory_space<vmem>>, vector<1x1x1xf32>
      tpu.vector_store %arg5[%c0_30, %c0_31, %c0_32], %89 {strides = array<i32>} : memref<1x1x1xf32, #tpu.memory_space<vmem>>, vector<1x1x1xf32>,
    } else {
    }
    %c0 = arith.constant 0 : index
    %c0_1 = arith.constant 0 : index
    %3 = vector.load %arg2[%c0, %c0_1] : memref<2x4xf32, #tpu.memory_space<vmem>>, vector<2x4xf32>
    %c0_2 = arith.constant 0 : index
    %c0_3 = arith.constant 0 : index
    %4 = vector.load %arg3[%c0_2, %c0_3] : memref<2x1xi32, #tpu.memory_space<vmem>>, vector<2x1xi32>
    %5 = tpu.iota {dimensions = array<i32: 1>} : vector<2x4xi32>
    %6 = vector.broadcast %4 : vector<2x1xi32> to vector<2x4xi32>
    %7 = arith.cmpi eq, %5, %6 : vector<2x4xi32>
    %8 = arith.extui %7 : vector<2x4xi1> to vector<2x4xi32>
    %9 = arith.sitofp %8 : vector<2x4xi32> to vector<2x4xf32>
    %cst = arith.constant dense<0xFF800000> : vector<2xf32>
    %10 = vector.multi_reduction <maximumf>, %3, %cst [1] : vector<2x4xf32> to vector<2xf32>
    %11 = vector.shape_cast %10 : vector<2xf32> to vector<2x1xf32>
    %12 = vector.broadcast %11 : vector<2x1xf32> to vector<2x4xf32>
    %13 = arith.subf %3, %12 : vector<2x4xf32>
    %14 = math.exp %13 : vector<2x4xf32>
    %cst_4 = arith.constant dense<0.000000e+00> : vector<2xf32>
    %15 = vector.multi_reduction <add>, %14, %cst_4 [1] : vector<2x4xf32> to vector<2xf32>
    %16 = vector.shape_cast %15 : vector<2xf32> to vector<2x1xf32>
    %17 = tpu.reciprocal %16 : vector<2x1xf32> -> vector<2x1xf32>
    %18 = math.log %16 : vector<2x1xf32>
    %19 = arith.addf %18, %11 : vector<2x1xf32>
    %20 = arith.mulf %3, %9 : vector<2x4xf32>
    %cst_5 = arith.constant dense<0.000000e+00> : vector<2xf32>
    %21 = vector.multi_reduction <add>, %20, %cst_5 [1] : vector<2x4xf32> to vector<2xf32>
    %22 = vector.shape_cast %21 : vector<2xf32> to vector<2x1xf32>
    %23 = arith.subf %19, %22 : vector<2x1xf32>
    %24 = vector.broadcast %17 : vector<2x1xf32> to vector<2x4xf32>
    %25 = arith.mulf %14, %24 : vector<2x4xf32>
    %26 = arith.mulf %14, %9 : vector<2x4xf32>
    %cst_6 = arith.constant dense<0.000000e+00> : vector<2xf32>
    %27 = vector.multi_reduction <add>, %26, %cst_6 [1] : vector<2x4xf32> to vector<2xf32>
    %28 = vector.shape_cast %27 : vector<2xf32> to vector<2x1xf32>
    %29 = arith.mulf %28, %17 : vector<2x1xf32>
    %30 = arith.mulf %16, %17 : vector<2x1xf32>
    %cst_7 = arith.constant 1.000000e+00 : f32
    %31 = vector.broadcast %cst_7 : f32 to vector<2x1xf32>
    %32 = arith.subf %31, %29 : vector<2x1xf32>
    %33 = arith.subf %30, %29 : vector<2x1xf32>
    %34 = arith.addf %32, %33 : vector<2x1xf32>
    %35 = arith.mulf %25, %25 : vector<2x4xf32>
    %cst_8 = arith.constant dense<0.000000e+00> : vector<2xf32>
    %36 = vector.multi_reduction <add>, %35, %cst_8 [1] : vector<2x4xf32> to vector<2xf32>
    %37 = vector.shape_cast %36 : vector<2xf32> to vector<2x1xf32>
    %cst_9 = arith.constant 2.000000e+00 : f32
    %38 = vector.broadcast %cst_9 : f32 to vector<2x1xf32>
    %39 = arith.mulf %38, %29 : vector<2x1xf32>
    %40 = arith.subf %37, %39 : vector<2x1xf32>
    %cst_10 = arith.constant 1.000000e+00 : f32
    %41 = vector.broadcast %cst_10 : f32 to vector<2x1xf32>
    %42 = arith.addf %40, %41 : vector<2x1xf32>
    %cst_11 = arith.constant 1.000000e-07 : f32
    %cst_12 = arith.constant 1.000000e+00 : f32
    %43 = vector.broadcast %cst_11 : f32 to vector<2x4xf32>
    %44 = arith.maximumf %43, %25 : vector<2x4xf32>
    %45 = vector.broadcast %cst_12 : f32 to vector<2x4xf32>
    %46 = arith.minimumf %45, %44 : vector<2x4xf32>
    %cst_13 = arith.constant dense<0.000000e+00> : vector<2xf32>
    %47 = vector.multi_reduction <add>, %46, %cst_13 [1] : vector<2x4xf32> to vector<2xf32>
    %48 = vector.shape_cast %47 : vector<2xf32> to vector<2x1xf32>
    %cst_14 = arith.constant 1.000000e-07 : f32
    %cst_15 = arith.constant 1.000000e+00 : f32
    %49 = vector.broadcast %cst_14 : f32 to vector<2x1xf32>
    %50 = arith.maximumf %49, %29 : vector<2x1xf32>
    %51 = vector.broadcast %cst_15 : f32 to vector<2x1xf32>
    %52 = arith.minimumf %51, %50 : vector<2x1xf32>
    %53 = arith.subf %48, %52 : vector<2x1xf32>
    %cst_16 = arith.constant 9.21034049 : f32
    %54 = vector.broadcast %cst_16 : f32 to vector<2x1xf32>
    %55 = arith.mulf %54, %53 : vector<2x1xf32>
    %c0_17 = arith.constant 0 : index
    %c0_18 = arith.constant 0 : index
    %56 = vector.load %arg4[%c0_17, %c0_18] : memref<2x4xf32, #tpu.memory_space<vmem>>, vector<2x4xf32>
    %57 = arith.negf %56 : vector<2x4xf32>
    %58 = math.exp %57 : vector<2x4xf32>
    %cst_19 = arith.constant 1.000000e+00 : f32
    %59 = vector.broadcast %cst_19 : f32 to vector<2x4xf32>
    %60 = arith.addf %59, %58 : vector<2x4xf32>
    %61 = arith.divf %59, %60 : vector<2x4xf32>
    %62 = vector.extract_strided_slice %61 {offsets = [0, 0], sizes = [2, 1], strides = [1, 1]} : vector<2x4xf32> to vector<2x1xf32>
    %63 = arith.mulf %62, %23 : vector<2x1xf32>
    %64 = vector.extract_strided_slice %61 {offsets = [0, 3], sizes = [2, 1], strides = [1, 1]} : vector<2x4xf32> to vector<2x1xf32>
    %65 = arith.mulf %64, %55 : vector<2x1xf32>
    %66 = arith.addf %63, %65 : vector<2x1xf32>
    %67 = vector.extract_strided_slice %61 {offsets = [0, 1], sizes = [2, 1], strides = [1, 1]} : vector<2x4xf32> to vector<2x1xf32>
    %68 = arith.mulf %67, %34 : vector<2x1xf32>
    %69 = arith.addf %66, %68 : vector<2x1xf32>
    %70 = vector.extract_strided_slice %61 {offsets = [0, 2], sizes = [2, 1], strides = [1, 1]} : vector<2x4xf32> to vector<2x1xf32>
    %71 = arith.mulf %70, %42 : vector<2x1xf32>
    %72 = arith.addf %69, %71 : vector<2x1xf32>
    %c1_i32 = arith.constant 1 : i32
    %73 = arith.muli %arg0, %c1_i32 : i32
    %74 = arith.addi %73, %arg1 : i32
    %c2_i32 = arith.constant 2 : i32
    %75 = arith.muli %74, %c2_i32 : i32
    %76 = tpu.iota {dimensions = array<i32: 0>} : vector<2x1xi32>
    %77 = vector.broadcast %75 : i32 to vector<2x1xi32>
    %78 = arith.addi %77, %76 : vector<2x1xi32>
    %c2_i32_20 = arith.constant 2 : i32
    %79 = vector.broadcast %c2_i32_20 : i32 to vector<2x1xi32>
    %80 = arith.cmpi slt, %78, %79 : vector<2x1xi32>
    %cst_21 = arith.constant 0.000000e+00 : f32
    %81 = vector.broadcast %cst_21 : f32 to vector<2x1xf32>
    %82 = arith.select %80, %72, %81 : vector<2x1xi1>, vector<2x1xf32>
    %c0_22 = arith.constant 0 : index
    %c0_23 = arith.constant 0 : index
    %c0_24 = arith.constant 0 : index
    %83 = vector.load %arg5[%c0_22, %c0_23, %c0_24] : memref<1x1x1xf32, #tpu.memory_space<vmem>>, vector<1x1x1xf32>
    %cst_25 = arith.constant dense<0.000000e+00> : vector<1xf32>
    %84 = vector.multi_reduction <add>, %82, %cst_25 [0] : vector<2x1xf32> to vector<1xf32>
    %85 = vector.shape_cast %84 : vector<1xf32> to vector<1x1xf32>
    %86 = vector.shape_cast %85 : vector<1x1xf32> to vector<1x1x1xf32>
    %87 = arith.addf %83, %86 : vector<1x1x1xf32>
    %c0_26 = arith.constant 0 : index
    %c0_27 = arith.constant 0 : index
    %c0_28 = arith.constant 0 : index
    %88 = vector.load %arg5[%c0_26, %c0_27, %c0_28] : memref<1x1x1xf32, #tpu.memory_space<vmem>>, vector<1x1x1xf32>
    tpu.vector_store %arg5[%c0_26, %c0_27, %c0_28], %87 {strides = array<i32>} : memref<1x1x1xf32, #tpu.memory_space<vmem>>, vector<1x1x1xf32>,
    return
  }
  func.func @transform_0(%arg0: i32, %arg1: i32) -> (i32, i32) {
    %c1_i32 = arith.constant 1 : i32
    %0 = arith.muli %arg0, %c1_i32 : i32
    %1 = arith.addi %0, %arg1 : i32
    %c0_i32 = arith.constant 0 : i32
    %c0_i32_0 = arith.constant 0 : i32
    return %1, %c0_i32 : i32, i32
  }
  func.func @transform_1(%arg0: i32, %arg1: i32) -> (i32, i32) {
    %c1_i32 = arith.constant 1 : i32
    %0 = arith.muli %arg0, %c1_i32 : i32
    %1 = arith.addi %0, %arg1 : i32
    %c0_i32 = arith.constant 0 : i32
    %c0_i32_0 = arith.constant 0 : i32
    return %1, %c0_i32 : i32, i32
  }
  func.func @transform_2(%arg0: i32, %arg1: i32) -> (i32, i32) {
    %c1_i32 = arith.constant 1 : i32
    %0 = arith.muli %arg0, %c1_i32 : i32
    %1 = arith.addi %0, %arg1 : i32
    %c0_i32 = arith.constant 0 : i32
    %c0_i32_0 = arith.constant 0 : i32
    return %1, %c0_i32 : i32, i32
  }
  func.func @transform_3(%arg0: i32, %arg1: i32) -> (i32, i32, i32) {
    %c0_i32 = arith.constant 0 : i32
    %c0_i32_0 = arith.constant 0 : i32
    %c0_i32_1 = arith.constant 0 : i32
    return %arg0, %c0_i32, %c0_i32_0 : i32, i32, i32
  }
}

</mosaic_0001>

<bundles_post_ra>
// kernel: tpu_custom_call.1
= control target key start
LH: loop header
LB: loop body
LE: loop exit
PB: predicated region body
PF: predicated region fallthrough
CT: control target
= control target key end

     0   :  { %vm82_vm0 = vcmask 25600   ;;  %v249_v3 = vmov 0   ;;  %s310_s0 = inlined_call_operand.vmem [shape: f32[2,4], index: 0, kind: input, shape index: {}]   ;;  %s311_s1 = inlined_call_operand.vmem [shape: s32[2,1], index: 1, kind: input, shape index: {}]   ;;  %s312_s2 = inlined_call_operand.vmem [shape: f32[2,4], index: 2, kind: input, shape index: {}]   ;;  %s313_s3 = inlined_call_operand.hbm [shape: f32[1,1,1], index: 3, kind: output, shape index: {}]  }
   0x1   :  { %v72_v0 = vld [vmem:[%s310_s0] sm:$0x3]  ;;  %213 = vset.pattern.permute.xlu1 %v249_v3  ;;  %214 = vset.pattern.permute.xlu0 %v249_v3 }
   0x2   :  { %v73_v1 = vld [vmem:[%s311_s1] sm:$0x3]  ;;  %v83_v2 = vsel %vm82_vm0, %v72_v0, -inf }
   0x3   :  { %8 = vsyncpa [#allocation3], 0  ;;  %84 = vmax.xlane.f32.xlu0 %v83_v2  ;;  %77 = vperm.xlu1 %213, %v73_v1   ;;  %vm70_vm1 = vcmask 0   ;;  %v250_v4 = vmov 0.0   ;;  %v74_v7 = vlaneseq  ;;  %v127_v16 = vld [vmem:[%s312_s2] sm:$0x3] }
   0x4   :  { %71 = vst.msk [vmem:[#allocation2] sm:$0x1] %vm70_vm1, %v250_v4  ;;  %v206_v17 = vmul.f32 -1.442695, %v127_v16  ;;  %s251_s2 = smov 127   ;;  %s252_s16 = smov 125  }
   0x5   :  { %v75_v9 = vand.u32 127, %v74_v7  ;;  %s253_s17 = smov 126   ;;  %v156_v56 = vshrl.u32 %v74_v7, 7  ;;  %vm162_vm4 = vcmask 1024   ;;  %s254_s18 = smov [#allocation2]  }
   0x6   :  { %s179_s19 = sshll.u32 %s254_s18, 4  ;;  %s180_s19 = int_to_ptr.vmem [resolvable:$true] %s179_s19 }
   0x7   :  { %vm159_vm3 = vcmp.lt.s32.totalorder %v156_v56, 2  ;;  %s225_s20 = scalar_lea.vmem %s180_s19, 16  ;;  %s229_s21 = scalar_lea.vmem %s180_s19, 32 }
   0x8   :  { %p226_p0 = scmp.ne.s32.totalorder %s180_s19, %s225_s20  ;;  %p230_p1 = scmp.lt.s32.totalorder %s180_s19, %s180_s19 }
   0x9   :  { %p231_p2 = scmp.lt.s32.totalorder %s229_s21, %s225_s20 }
   0xb   :  { %p232_p3 = por %p231_p2, %p230_p1 }
   0xd   :  { %p233_p4 = pnand %p232_p3, %p226_p0 }
  0x82   :  { %v78_v10 = vpop.permute.xlu1 %77 }
  0x83   :  { %vm79_vm2 = vcmp.eq.s32.totalorder %v75_v9, %v78_v10 }
  0x84   :  { %v205_v11 = vsel %vm79_vm2, 1.0, %v250_v4 }
  0x85   :  { %v96_v36 = vmul.f32 %v205_v11, %v72_v0 }
  0x87   :  { %v97_v37 = vsel %vm82_vm0, %v96_v36, 0.0 }
  0x90   :  { %v283_v5 = vpop.xlane.xlu0 %84 }
  0x91   :  { %v86_v6 = vsub.f32 %v72_v0, %v283_v5 }
  0x93   :  { %v87_v8 = vmul.f32 1.442695, %v86_v6 }
  0x95   :  { %215 = vpow2.f32 %v87_v8 }
  0x96   :  { %217 = vpow2.f32 %v206_v17 }
  0x9f   :  { %v216_v12 = vpop.eup %215 }
  0xa0   :  { %v89_v13 = vsel %vm82_vm0, %v216_v12, 0.0  ;;  %v102_v14 = vmul.f32 %v216_v12, %v205_v11  ;;  %v218_v18 = vpop.eup %217 }
  0xa1   :  { %90 = vadd.xlane.f32.xlu0 %v89_v13  ;;  %v131_v20 = vadd.f32 1.0, %v218_v18 }
  0xa2   :  { %v103_v15 = vsel %vm82_vm0, %v102_v14, 0.0 }
  0xa3   :  { %104 = vadd.xlane.f32.xlu1 %v103_v15 }
 0x12e   :  { %v91_v19 = vpop.xlane.xlu0 %90 }
 0x12f   :  { %219 = vrcp.f32 %v91_v19 }
 0x130   :  { %221 = vrcp.f32 %v131_v20  ;;  %v105_v22 = vpop.xlane.xlu1 %104 }
 0x131   :  { %223 = vlog2.f32 %v91_v19 }
 0x139   :  { %v220_v21 = vpop.eup %219 }
 0x13a   :  { %v107_v23 = vmul.f32 %v220_v21, %v91_v19  ;;  %v106_v24 = vmul.f32 %v220_v21, %v105_v22  ;;  %v101_v25 = vmul.f32 %v220_v21, %v216_v12  ;;  %v222_v29 = vpop.eup %221 }
 0x13b   :  { %v224_v49 = vpop.eup %223 }
 0x13c   :  { %v118_v26 = vmax.f32 %v101_v25, 1e-07  ;;  %v108_v27 = vsub.f32 1.0, %v106_v24  ;;  %v109_v28 = vsub.f32 %v107_v23, %v106_v24  ;;  %v111_v34 = vmul.f32 %v101_v25, %v101_v25 }
 0x13d   :  { %v123_v38 = vmax.f32 %v106_v24, 1e-07  ;;  %v115_v43 = vmul.f32 2.0, %v106_v24  ;;  %v94_v50 = vmul.f32 0.6931472, %v224_v49 }
 0x13e   :  { %v119_v30 = vmin.f32 %v118_v26, 1.0  ;;  %v110_v31 = vadd.f32 %v109_v28, %v108_v27  ;;  %v112_v35 = vsel %vm82_vm0, %v111_v34, 0.0 }
 0x13f   :  { %v124_v39 = vmin.f32 %v123_v38, 1.0  ;;  %v95_v52 = vadd.f32 %v94_v50, %v283_v5  ;;  %v161_v5 = vld [vmem:[#allocation2] sm:$0x1] }
 0x140   :  { %v120_v32 = vsel %vm82_vm0, %v119_v30, 0.0  ;;  %v141_v33 = vmul.f32 %v222_v29, %v110_v31 }
 0x141   :  { %121 = vadd.xlane.f32.xlu0 %v120_v32 }
 0x142   :  { %143 = vrot.lane.b32.xlu1 %v141_v33, %s251_s2 }
 0x145   :  { %113 = vadd.xlane.f32.xlu0 %v112_v35 }
 0x149   :  { %98 = vadd.xlane.f32.xlu0 %v97_v37 }
 0x1b4   :  { %v144_v58 = vpop.permute.xlu1 %143 }
 0x1ce   :  { %v122_v40 = vpop.xlane.xlu0 %121 }
 0x1cf   :  { %v125_v41 = vsub.f32 %v122_v40, %v124_v39 }
 0x1d1   :  { %v126_v42 = vmul.f32 9.2103405, %v125_v41 }
 0x1d2   :  { %v114_v44 = vpop.xlane.xlu0 %113 }
 0x1d3   :  { %v135_v45 = vmul.f32 %v222_v29, %v126_v42  ;;  %v116_v46 = vsub.f32 %v114_v44, %v115_v43 }
 0x1d5   :  { %v117_v47 = vadd.f32 1.0, %v116_v46  ;;  %137 = vrot.lane.b32.xlu0 %v135_v45, %s252_s16 }
 0x1d6   :  { %v99_v51 = vpop.xlane.xlu0 %98 }
 0x1d7   :  { %v147_v48 = vmul.f32 %v222_v29, %v117_v47  ;;  %v100_v53 = vsub.f32 %v95_v52, %v99_v51 }
 0x1d9   :  { %149 = vrot.lane.b32.xlu0 %v147_v48, %s253_s17  ;;  %v134_v54 = vmul.f32 %v222_v29, %v100_v53 }
 0x247   :  { %v138_v55 = vpop.permute.xlu0 %137 }
 0x248   :  { %v140_v57 = vadd.f32 %v138_v55, %v134_v54 }
 0x24a   :  { %v146_v59 = vadd.f32 %v144_v58, %v140_v57 }
 0x24b   :  { %v150_v60 = vpop.permute.xlu0 %149 }
 0x24c   :  { %v152_v61 = vadd.f32 %v150_v60, %v146_v59 }
 0x24e   :  { %v160_v62 = vsel %vm159_vm3, %v152_v61, 0.0 }
 0x24f   :  { %v163_v63 = vsel %vm162_vm4, %v160_v62, 0.0 }
 0x250   :  { %v164_v0 = vrot.slane %v163_v63, 4 }
 0x252   :  { %v165_v1 = vadd.f32 %v164_v0, %v163_v63 }
 0x254   :  { %v166_v2 = vrot.slane %v165_v1, 2 }
 0x256   :  { %v167_v3 = vadd.f32 %v166_v2, %v165_v1 }
 0x258   :  { %v168_v4 = vrot.slane %v167_v3, 1 }
 0x25a   :  { %v169_v6 = vadd.f32 %v168_v4, %v167_v3 }
 0x25c   :  { %v170_v8 = vadd.f32 %v169_v6, %v161_v5 }
 0x25e   :  { %172 = vst.msk [vmem:[#allocation2] sm:$0x1] %vm70_vm1, %v170_v8 }
 0x25f   :  { %236 = shalt.err (!%p233_p4)
}
 0x260   :  { %s237_s24 = scalar_lea.hbm %s313_s3, 16 }
 0x261   :  { %p238_p5 = scmp.ne.s32.totalorder %s313_s3, %s237_s24  ;;  %p241_p6 = scmp.lt.u32.totalorder %s237_s24, %s313_s3 }
 0x263   :  { %p243_p7 = pnand %p241_p6, %p238_p5 }
 0x265   :  { %246 = shalt.err (!%p243_p7)
}
 0x266   :  { %182 = dma.vmem_to_hbm [thread:$0]  %s180_s19, 16, %s313_s3, [#allocation3]  }
 0x267   :  { %247 = dma.done.wait [#allocation3], 16  }
 0x268   :  { %248 = vsyncadd [#allocation3], 4294967280 }
 0x269   :  { %186 = vsyncpa [#allocation3], 1 }

</bundles_post_ra>
